<compile_context>
chip_gen: v6e
topology: v6e:2x2x1
jax: 0.10.0
libtpu: 0.0.40
codegen_flags: <defaults>
</compile_context>

<pallas_src>
import functools

import jax
import jax.numpy as jnp
from jax.experimental import pallas as pl
from jax.experimental.pallas import tpu as pltpu

IN_DIM = 5
HID_DIM = 14
OUT_DIM = 32


def mlp_kernel(x_ref, w1_ref, b1_ref, w2_ref, b2_ref, o_ref, *, operand_dtype):
    # x_ref : [IN_DIM, tb]   (batch on lanes -> lane-dense loads / matmuls)
    # w1_ref: [HID, IN]      b1_ref: [HID, 1]
    # w2_ref: [OUT, HID]     b2_ref: [OUT, 1]
    # o_ref : [tb, OUT]      natural (batch, feature) layout
    x = x_ref[...].astype(operand_dtype)          # in-kernel cast (== x.float())
    w1 = w1_ref[...].astype(operand_dtype)
    w2 = w2_ref[...].astype(operand_dtype)

    # Layer 1: [HID, IN] @ [IN, tb] -> f32 acc, + bias, relu (h never leaves VMEM).
    h = jnp.dot(w1, x, preferred_element_type=jnp.float32) + b1_ref[...]
    h = jnp.maximum(h, 0.0)

    # (dropout: eval-mode no-op)

    # Layer 2: [OUT, HID] @ [HID, tb] -> f32 acc, + bias.
    y = jnp.dot(w2, h.astype(operand_dtype),
                preferred_element_type=jnp.float32) + b2_ref[...]

    # Transpose on the XLU so the HBM write is the natural [tb, OUT] layout
    # (eliminates the wrapper-side output transpose HBM pass).
    o_ref[...] = y.T.astype(o_ref.dtype)


def _batch_tiling(batch, tb_max):
    """Near-equal 128-multiple batch tiles; >=2 (even) tiles when possible."""
    granules = pl.cdiv(batch, 128)                 # 128-row granules
    n_tiles = pl.cdiv(granules * 128, tb_max)
    if granules >= 2:
        n_tiles = max(n_tiles, 2)                  # v7x megacore: feed both TCs
        if n_tiles % 2:
            n_tiles += 1                           # prefer an even tile count
    n_tiles = min(n_tiles, granules)               # never create empty tiles
    tb = pl.cdiv(granules, n_tiles) * 128
    return tb, n_tiles, tb * n_tiles


def mlp_forward(x, w1, b1, w2, b2, *, tb_max=16384, operand_dtype=jnp.bfloat16):
    """x: [B, 5]; w1: [5, 14]; b1: [1, 14]; w2: [14, 32]; b2: [1, 32] -> [B, 32] f32."""
    B = x.shape[0]
    tb, n_tiles, b_pad = _batch_tiling(B, tb_max)

    # Batch-on-lanes input; dtype untouched (the kernel does the x.float() cast).
    x_t = x.T                                       # [IN_DIM, B]
    if b_pad != B:
        x_t = jnp.pad(x_t, ((0, 0), (0, b_pad - B)))

    out = pl.pallas_call(
        functools.partial(mlp_kernel, operand_dtype=operand_dtype),
        out_shape=jax.ShapeDtypeStruct((b_pad, OUT_DIM), jnp.float32),
        grid_spec=pl.GridSpec(
            grid=(n_tiles,),
            in_specs=[
                pl.BlockSpec((IN_DIM, tb), lambda i: (0, i)),       # x tile (pipelined)
                pl.BlockSpec((HID_DIM, IN_DIM), lambda i: (0, 0)),  # resident weights
                pl.BlockSpec((HID_DIM, 1), lambda i: (0, 0)),
                pl.BlockSpec((OUT_DIM, HID_DIM), lambda i: (0, 0)),
                pl.BlockSpec((OUT_DIM, 1), lambda i: (0, 0)),
            ],
            out_specs=pl.BlockSpec((tb, OUT_DIM), lambda i: (i, 0)),  # natural [B, 32]
        ),
        compiler_params=pltpu.CompilerParams(
            dimension_semantics=("parallel",),       # megacore sharding on v7x
            vmem_limit_bytes=48 * 1024 * 1024,       # ~30 MiB worst case @ tb=16384
        ),
    )(x_t, w1.T, b1.T, w2.T, b2.T)

    # Drop batch padding before anything downstream sees it.
    return out[:B] if b_pad != B else out


def init_params(key):
    # Deterministic init mimicking nn.Linear's uniform(-1/sqrt(fan_in), +1/sqrt(fan_in)).
    k1, k2, k3, k4 = jax.random.split(key, 4)
    lim1 = 1.0 / (IN_DIM ** 0.5)
    lim2 = 1.0 / (HID_DIM ** 0.5)
    w1 = jax.random.uniform(k1, (IN_DIM, HID_DIM), jnp.float32, -lim1, lim1)
    b1 = jax.random.uniform(k2, (1, HID_DIM), jnp.float32, -lim1, lim1)
    w2 = jax.random.uniform(k3, (HID_DIM, OUT_DIM), jnp.float32, -lim2, lim2)
    b2 = jax.random.uniform(k4, (1, OUT_DIM), jnp.float32, -lim2, lim2)
    return w1, b1, w2, b2


if __name__ == "__main__":
    key = jax.random.PRNGKey(0)
    kx, kp = jax.random.split(key)
    B = 300   # small + ragged: exercises 128-granule padding and a 2-tile grid
    x = jax.random.normal(kx, (B, IN_DIM), jnp.float32)
    w1, b1, w2, b2 = init_params(kp)

    ref = jnp.maximum(x @ w1 + b1, 0.0) @ w2 + b2

    # Default fast path: bf16 MXU operands, f32 accumulation / f32 output.
    out = mlp_forward(x, w1, b1, w2, b2)
    jax.block_until_ready(out)
    assert out.shape == (B, OUT_DIM)
    assert jnp.allclose(out, ref, atol=5e-2, rtol=5e-2)

    # Exact f32 path (bit-for-bit semantics of the PyTorch module's forward).
    out_f32 = mlp_forward(x, w1, b1, w2, b2, operand_dtype=jnp.float32)
    jax.block_until_ready(out_f32)
    assert jnp.allclose(out_f32, ref, atol=1e-5, rtol=1e-5)

    print("KERNEL_OK")
</pallas_src>

<mosaic_0001>
module attributes {stable_mosaic.version = 11 : i64} {
  func.func @mlp_kernel(%arg0: i32, %arg1: memref<5x256xf32, #tpu.memory_space<vmem>>, %arg2: memref<14x5xf32, #tpu.memory_space<vmem>>, %arg3: memref<14x1xf32, #tpu.memory_space<vmem>>, %arg4: memref<32x14xf32, #tpu.memory_space<vmem>>, %arg5: memref<32x1xf32, #tpu.memory_space<vmem>>, %arg6: memref<256x32xf32, #tpu.memory_space<vmem>>) attributes {dimension_semantics = [#tpu.dimension_semantics<parallel>], iteration_bounds = array<i64: 2>, scalar_prefetch = 0 : i64, scratch_operands = 0 : i64, tpu.core_type = #tpu.core_type<tc>, window_params = [{transform_indices = @transform_0, window_bounds = array<i64: 5, 256>}, {pipeline_mode = #tpu.pipeline_mode<synchronous>, transform_indices = @transform_1, window_bounds = array<i64: 14, 5>}, {pipeline_mode = #tpu.pipeline_mode<synchronous>, transform_indices = @transform_2, window_bounds = array<i64: 14, 1>}, {pipeline_mode = #tpu.pipeline_mode<synchronous>, transform_indices = @transform_3, window_bounds = array<i64: 32, 14>}, {pipeline_mode = #tpu.pipeline_mode<synchronous>, transform_indices = @transform_4, window_bounds = array<i64: 32, 1>}, {transform_indices = @transform_5, window_bounds = array<i64: 256, 32>}]} {
    %c0 = arith.constant 0 : index
    %c0_0 = arith.constant 0 : index
    %0 = vector.load %arg1[%c0, %c0_0] : memref<5x256xf32, #tpu.memory_space<vmem>>, vector<5x256xf32>
    %1 = arith.truncf %0 : vector<5x256xf32> to vector<5x256xbf16>
    %c0_1 = arith.constant 0 : index
    %c0_2 = arith.constant 0 : index
    %2 = vector.load %arg2[%c0_1, %c0_2] : memref<14x5xf32, #tpu.memory_space<vmem>>, vector<14x5xf32>
    %3 = arith.truncf %2 : vector<14x5xf32> to vector<14x5xbf16>
    %c0_3 = arith.constant 0 : index
    %c0_4 = arith.constant 0 : index
    %4 = vector.load %arg4[%c0_3, %c0_4] : memref<32x14xf32, #tpu.memory_space<vmem>>, vector<32x14xf32>
    %5 = arith.truncf %4 : vector<32x14xf32> to vector<32x14xbf16>
    %cst = arith.constant dense<0.000000e+00> : vector<14x256xf32>
    %6 = tpu.matmul %3, %1, %cst {dimension_numbers = #tpu.dot_dimension_numbers<[1], [0], [0], [1], [0, 0, 1, 1], [], []>} : vector<14x5xbf16>, vector<5x256xbf16>, vector<14x256xf32> -> vector<14x256xf32>
    %c0_5 = arith.constant 0 : index
    %c0_6 = arith.constant 0 : index
    %7 = vector.load %arg3[%c0_5, %c0_6] : memref<14x1xf32, #tpu.memory_space<vmem>>, vector<14x1xf32>
    %8 = vector.broadcast %7 : vector<14x1xf32> to vector<14x256xf32>
    %9 = arith.addf %6, %8 : vector<14x256xf32>
    %cst_7 = arith.constant 0.000000e+00 : f32
    %10 = vector.broadcast %cst_7 : f32 to vector<14x256xf32>
    %11 = arith.maximumf %9, %10 : vector<14x256xf32>
    %12 = arith.truncf %11 : vector<14x256xf32> to vector<14x256xbf16>
    %cst_8 = arith.constant dense<0.000000e+00> : vector<32x256xf32>
    %13 = tpu.matmul %5, %12, %cst_8 {dimension_numbers = #tpu.dot_dimension_numbers<[1], [0], [0], [1], [0, 0, 1, 1], [], []>} : vector<32x14xbf16>, vector<14x256xbf16>, vector<32x256xf32> -> vector<32x256xf32>
    %c0_9 = arith.constant 0 : index
    %c0_10 = arith.constant 0 : index
    %14 = vector.load %arg5[%c0_9, %c0_10] : memref<32x1xf32, #tpu.memory_space<vmem>>, vector<32x1xf32>
    %15 = vector.broadcast %14 : vector<32x1xf32> to vector<32x256xf32>
    %16 = arith.addf %13, %15 : vector<32x256xf32>
    %17 = tpu.transpose %16, [1, 0] : vector<32x256xf32> -> vector<256x32xf32>
    %c0_11 = arith.constant 0 : index
    %c0_12 = arith.constant 0 : index
    %18 = vector.load %arg6[%c0_11, %c0_12] : memref<256x32xf32, #tpu.memory_space<vmem>>, vector<256x32xf32>
    tpu.vector_store %arg6[%c0_11, %c0_12], %17 {strides = array<i32>} : memref<256x32xf32, #tpu.memory_space<vmem>>, vector<256x32xf32>,
    return
  }
  func.func @transform_0(%arg0: i32) -> (i32, i32) {
    %c0_i32 = arith.constant 0 : i32
    %c0_i32_0 = arith.constant 0 : i32
    return %c0_i32, %arg0 : i32, i32
  }
  func.func @transform_1(%arg0: i32) -> (i32, i32) {
    %c0_i32 = arith.constant 0 : i32
    %c0_i32_0 = arith.constant 0 : i32
    %c0_i32_1 = arith.constant 0 : i32
    return %c0_i32, %c0_i32_0 : i32, i32
  }
  func.func @transform_2(%arg0: i32) -> (i32, i32) {
    %c0_i32 = arith.constant 0 : i32
    %c0_i32_0 = arith.constant 0 : i32
    %c0_i32_1 = arith.constant 0 : i32
    return %c0_i32, %c0_i32_0 : i32, i32
  }
  func.func @transform_3(%arg0: i32) -> (i32, i32) {
    %c0_i32 = arith.constant 0 : i32
    %c0_i32_0 = arith.constant 0 : i32
    %c0_i32_1 = arith.constant 0 : i32
    return %c0_i32, %c0_i32_0 : i32, i32
  }
  func.func @transform_4(%arg0: i32) -> (i32, i32) {
    %c0_i32 = arith.constant 0 : i32
    %c0_i32_0 = arith.constant 0 : i32
    %c0_i32_1 = arith.constant 0 : i32
    return %c0_i32, %c0_i32_0 : i32, i32
  }
  func.func @transform_5(%arg0: i32) -> (i32, i32) {
    %c0_i32 = arith.constant 0 : i32
    %c0_i32_0 = arith.constant 0 : i32
    return %arg0, %c0_i32 : i32, i32
  }
}

</mosaic_0001>

<bundles_post_ra>
// kernel: tpu_custom_call.1
= control target key start
LH: loop header
LB: loop body
LE: loop exit
PB: predicated region body
PF: predicated region fallthrough
CT: control target
= control target key end

     0   :  { %s629_s18 = smov 0   ;;  %s752_s0 = inlined_call_operand.vmem [shape: f32[5,512], index: 0, kind: input, shape index: {}]   ;;  %s753_s1 = inlined_call_operand.vmem [shape: f32[14,5], index: 1, kind: input, shape index: {}]   ;;  %s754_s2 = inlined_call_operand.vmem [shape: f32[14,1], index: 2, kind: input, shape index: {}]   ;;  %s755_s3 = inlined_call_operand.vmem [shape: f32[32,14], index: 3, kind: input, shape index: {}]   ;;  %s756_s4 = inlined_call_operand.vmem [shape: f32[32,1], index: 4, kind: input, shape index: {}]   ;;  %s757_s5 = inlined_call_operand.vmem [shape: f32[512,32], index: 5, kind: output, shape index: {}]  }
   0x1 LB: > { %s561_s19 = sadd.s32 4294967295, %s595_s18   ;;  %p565_p0 = scmp.ge.s32.totalorder %s595_s18, 1  ;;  %s595_s18 = sphi %s629_s18, %s15_s18  }
   0x2   : > { %p188_p1 = scmp.lt.s32.totalorder %s595_s18, 3 }
   0x4   : > { %p189_p2 = pnand %p565_p0, %p188_p1 }
   0x5   : > { %s566_s20 = sshll.u32 (!%p189_p2), %s561_s19, 1  ;;  %s568_s26 = sshll.u32 (!%p189_p2), %s561_s19, 5 }
   0x6   : > { %192 = sbr.rel (%p189_p2) target bundleno = 615 (0x267), region = 40  ;;  %p217_p3 = scmp.lt.s32.totalorder (!%p189_p2), %s566_s20, 3 }
   0x7   : > { %p223_p4 = scmp.lt.s32.totalorder (!%p189_p2), %s568_s26, 63 }
   0xb   : > { %vm258_vm0 = vcmask 1041408   ;;  %v597_v0 = vmov 0   ;;  %v242_v1 = vld [vmem:[%s754_s2] sm:$0xff]  ;;  %s759_s20 = smov (!%p217_p3, %s566_s20), 3  ;;  %v243_v2 = vld [vmem:[%s754_s2 + $0x8] sm:$0x3f] }
   0xc   : > { %300 = vmatprep.mubr.bf16.mxu0 %v597_v0  ;;  %587 = vset.pattern.permute.xlu0 %v597_v0  ;;  %vm259_vm1 = vcmask 1042432   ;;  %v598_v3 = vmov 65535   ;;  %s567_s25 = sshll.u32 %s759_s20, 3  ;;  %v319_v8 = vld [vmem:[%s756_s4 + $0x10] sm:$0xff]  ;;  %v233_v11 = vld [vmem:[%s753_s1] sm:$0xff]  ;;  %vm254_vm2 = vcmask 39936  }
   0xd   : > { %246 = vperm.xlu0 %587, %v242_v1   ;;  %387 = vmatprep.mubr.bf16.mxu1 %v597_v0  ;;  %v260_v4 = vsel %vm258_vm0, 4294967295, %v598_v3  ;;  %s220_s28 = scalar_lea.vmem %s752_s0, %s567_s25  ;;  %v234_v12 = vld [vmem:[%s753_s1 + $0x8] sm:$0x3f]  ;;  %v317_v16 = vld [vmem:[%s756_s4] sm:$0xff]  ;;  %v320_v18 = vld [vmem:[%s756_s4 + $0x18] sm:$0xff]  ;;  %vm348_vm3 = vcmask 1046528  }
   0xe   : > { %588 = vset.pattern.permute.xlu1 %v597_v0  ;;  %v230_v5 = vld [vmem:[%s220_s28 + $0x8] sm:$0x1f]  ;;  %v261_v6 = vsel %vm259_vm1, %v260_v4, 0  ;;  %v229_v7 = vld [vmem:[%s220_s28] sm:$0x1f]  ;;  %v235_v15 = vpack.c.bf16 %v234_v12, %v233_v11  ;;  %vm341_vm4 = vcmask 113664  }
   0xf   : > { %v232_v9 = vpack.c.bf16 %v230_v5, %v230_v5  ;;  %v231_v10 = vpack.c.bf16 %v229_v7, %v229_v7  ;;  %323 = vperm.xlu1 %588, %v317_v16   ;;  %v318_v17 = vld [vmem:[%s756_s4 + $0x8] sm:$0xff]  ;;  %v236_v34 = vld [vmem:[%s755_s3] sm:$0xff]  ;;  %v238_v39 = vld [vmem:[%s755_s3 + $0x10] sm:$0xff]  ;;  %s761_s26 = smov (!%p223_p4, %s568_s26), 63  ;;  %vm472_vm5 = vcmask 261120  }
  0x10   : > { %v237_v35 = vld [vmem:[%s755_s3 + $0x8] sm:$0xff]  ;;  %v239_v40 = vld [vmem:[%s755_s3 + $0x18] sm:$0xff]  ;;  %s569_s27 = sshll.u32 %s761_s26, 3 }
  0x11   : > { %251 = vperm.xlu0 %587, %v243_v2   ;;  %v266_v13 = vand.u32 %v261_v6, %v232_v9  ;;  %v263_v14 = vand.u32 %v261_v6, %v231_v10  ;;  %v240_v38 = vpack.c.bf16 %v237_v35, %v236_v34  ;;  %v241_v41 = vpack.c.bf16 %v239_v40, %v238_v39  ;;  %s683_s30 = scalar_lea.vmem %s757_s5, %s569_s27 }
  0x13   : > { %282 = vmatprep.subr.bf16.mxu0 %v266_v13  ;;  %328 = vperm.xlu1 %588, %v318_v17  }
  0x14   : > { %283 = vmatpush1.bf16.msra.mxu0 %v263_v14 }
  0x15   : > { %333 = vperm.xlu0 %587, %v319_v8  }
  0x17   : > { %570 = vmatmul.mubr.msk.bf16.vlgmr.msra.gmra.mxu0 %vm254_vm2, %v235_v15  ;;  %338 = vperm.xlu1 %588, %v320_v18  }
  0x88   : > { %v247_v19 = vpop.permute.xlu0 %246 }
  0x8a   : > { %v324_v42 = vpop.permute.xlu1 %323 }
  0x8c   : > { %v252_v23 = vpop.permute.xlu0 %251 }
  0x8e   : > { %v329_v47 = vpop.permute.xlu1 %328 }
  0x90   : > { %v334_v52 = vpop.permute.xlu0 %333 }
  0x92   : > { %v339_v57 = vpop.permute.xlu1 %338 }
  0xd7   : > { %v302_v20 = vpop.f32.mrf.mxu0 }
  0xd8   : > { %v303_v22 = vadd.f32 %v302_v20, %v247_v19 }
  0xd9   : > { %v304_v21 = vpop.f32.mrf.mxu0 }
  0xda   : > { %v305_v25 = vadd.f32 %v304_v21, %v247_v19  ;;  %v311_v28 = vmax.f32 %v303_v22, 0.0 }
  0xdb   : > { %v306_v24 = vpop.f32.mrf.mxu0 }
  0xdc   : > { %v307_v26 = vadd.f32 %v306_v24, %v252_v23  ;;  %v312_v31 = vmax.f32 %v305_v25, 0.0 }
  0xdd   : > { %v308_v27 = vpop.f32.mrf.mxu0 }
  0xde   : > { %v313_v29 = vmax.f32 %v307_v26, 0.0  ;;  %v309_v30 = vadd.f32 %v308_v27, %v252_v23 }
  0xe0   : > { %v314_v32 = vmax.f32 %v309_v30, 0.0  ;;  %v315_v33 = vpack.c.bf16 %v313_v29, %v311_v28 }
  0xe2   : > { %v316_v36 = vpack.c.bf16 %v314_v32, %v312_v31  ;;  %v350_v37 = vsel %vm348_vm3, %v315_v33, 0 }
  0xe4   : > { %571 = vmatprep.subr.msk.bf16.mxu1 %vm348_vm3, %v316_v36 }
  0xe5   : > { %370 = vmatpush1.bf16.msra.mxu1 %v350_v37 }
  0xe8   : > { %572 = vmatmul.mubr.msk.bf16.vlgmr.msra.gmra.mxu1 %vm341_vm4, %v240_v38 }
  0xe9   : > { %397 = vmatprep.mubr.bf16.mxu1 %v597_v0 }
  0xf0   : > { %573 = vmatmul.mubr.msk.bf16.gmra.mxu1 %vm341_vm4, %v241_v41 }
 0x1a8   : > { %v389_v43 = vpop.f32.mrf.mxu1 }
 0x1a9   : > { %v390_v44 = vadd.f32 %v389_v43, %v324_v42 }
 0x1aa   : > { %v391_v45 = vpop.f32.mrf.mxu1 }
 0x1ab   : > { %v392_v46 = vadd.f32 %v391_v45, %v324_v42  ;;  %408 = vxpose.xlu0.b32.start [1/4] (short) %v390_v44, 128 }
 0x1ac   : > { %v393_v48 = vpop.f32.mrf.mxu1 }
 0x1ad   : > { %v394_v49 = vadd.f32 %v393_v48, %v329_v47  ;;  %440 = vxpose.xlu1.b32.start [1/4] (short) %v392_v46, 128 }
 0x1ae   : > { %v395_v50 = vpop.f32.mrf.mxu1 }
 0x1af   : > { %v396_v51 = vadd.f32 %v395_v50, %v329_v47  ;;  %409 = vxpose.xlu0.b32.cont [2/4] (short) %v394_v49, 128 }
 0x1b0   : > { %v399_v53 = vpop.f32.mrf.mxu1 }
 0x1b1   : > { %v400_v54 = vadd.f32 %v399_v53, %v334_v52  ;;  %441 = vxpose.xlu1.b32.cont [2/4] (short) %v396_v51, 128 }
 0x1b2   : > { %v401_v55 = vpop.f32.mrf.mxu1 }
 0x1b3   : > { %v402_v56 = vadd.f32 %v401_v55, %v334_v52  ;;  %410 = vxpose.xlu0.b32.cont [3/4] (short) %v400_v54, 128 }
 0x1b4   : > { %v403_v58 = vpop.f32.mrf.mxu1 }
 0x1b5   : > { %v404_v59 = vadd.f32 %v403_v58, %v339_v57  ;;  %442 = vxpose.xlu1.b32.cont [3/4] (short) %v402_v56, 128 }
 0x1b6   : > { %v405_v60 = vpop.f32.mrf.mxu1 }
 0x1b7   : > { %v406_v61 = vadd.f32 %v405_v60, %v339_v57  ;;  %411 = vxpose.xlu0.b32.end [4/4] (short) %v404_v59, 128 }
 0x1b9   : > { %443 = vxpose.xlu1.b32.end [4/4] (short) %v406_v61, 128 }
 0x227   : > { %v424_v62 = vpop.trf.xlu0 }
 0x228   : > { %473 = vst.msk [vmem:[%s683_s30] sm:$0xff] %vm472_vm5, %v424_v62 }
 0x229   : > { %v456_v63 = vpop.trf.xlu1 }
 0x22a   : > { %489 = vst.msk [vmem:[%s683_s30 + $0x80] sm:$0xff] %vm472_vm5, %v456_v63 }
 0x22b   : > { %v425_v0 = vpop.trf.xlu0 }
 0x22c   : > { %474 = vst.msk [vmem:[%s683_s30 + $0x8] sm:$0xff] %vm472_vm5, %v425_v0 }
 0x22d   : > { %v457_v1 = vpop.trf.xlu1 }
 0x22e   : > { %490 = vst.msk [vmem:[%s683_s30 + $0x88] sm:$0xff] %vm472_vm5, %v457_v1 }
 0x22f   : > { %v426_v2 = vpop.trf.xlu0 }
 0x230   : > { %475 = vst.msk [vmem:[%s683_s30 + $0x10] sm:$0xff] %vm472_vm5, %v426_v2 }
 0x231   : > { %v458_v3 = vpop.trf.xlu1 }
 0x232   : > { %491 = vst.msk [vmem:[%s683_s30 + $0x90] sm:$0xff] %vm472_vm5, %v458_v3 }
 0x233   : > { %v427_v4 = vpop.trf.xlu0 }
 0x234   : > { %476 = vst.msk [vmem:[%s683_s30 + $0x18] sm:$0xff] %vm472_vm5, %v427_v4 }
 0x235   : > { %v459_v5 = vpop.trf.xlu1 }
 0x236   : > { %492 = vst.msk [vmem:[%s683_s30 + $0x98] sm:$0xff] %vm472_vm5, %v459_v5 }
 0x237   : > { %v428_v6 = vpop.trf.xlu0 }
 0x238   : > { %477 = vst.msk [vmem:[%s683_s30 + $0x20] sm:$0xff] %vm472_vm5, %v428_v6 }
 0x239   : > { %v460_v7 = vpop.trf.xlu1 }
 0x23a   : > { %493 = vst.msk [vmem:[%s683_s30 + $0xa0] sm:$0xff] %vm472_vm5, %v460_v7 }
 0x23b   : > { %v429_v8 = vpop.trf.xlu0 }
 0x23c   : > { %478 = vst.msk [vmem:[%s683_s30 + $0x28] sm:$0xff] %vm472_vm5, %v429_v8 }
 0x23d   : > { %v461_v9 = vpop.trf.xlu1 }
 0x23e   : > { %494 = vst.msk [vmem:[%s683_s30 + $0xa8] sm:$0xff] %vm472_vm5, %v461_v9 }
 0x23f   : > { %v430_v10 = vpop.trf.xlu0 }
 0x240   : > { %479 = vst.msk [vmem:[%s683_s30 + $0x30] sm:$0xff] %vm472_vm5, %v430_v10 }
 0x241   : > { %v462_v11 = vpop.trf.xlu1 }
 0x242   : > { %495 = vst.msk [vmem:[%s683_s30 + $0xb0] sm:$0xff] %vm472_vm5, %v462_v11 }
 0x243   : > { %v431_v12 = vpop.trf.xlu0 }
 0x244   : > { %480 = vst.msk [vmem:[%s683_s30 + $0x38] sm:$0xff] %vm472_vm5, %v431_v12 }
 0x245   : > { %v463_v13 = vpop.trf.xlu1 }
 0x246   : > { %496 = vst.msk [vmem:[%s683_s30 + $0xb8] sm:$0xff] %vm472_vm5, %v463_v13 }
 0x247   : > { %v432_v14 = vpop.trf.xlu0 }
 0x248   : > { %481 = vst.msk [vmem:[%s683_s30 + $0x40] sm:$0xff] %vm472_vm5, %v432_v14 }
 0x249   : > { %v464_v15 = vpop.trf.xlu1 }
 0x24a   : > { %497 = vst.msk [vmem:[%s683_s30 + $0xc0] sm:$0xff] %vm472_vm5, %v464_v15 }
 0x24b   : > { %v433_v16 = vpop.trf.xlu0 }
 0x24c   : > { %482 = vst.msk [vmem:[%s683_s30 + $0x48] sm:$0xff] %vm472_vm5, %v433_v16 }
 0x24d   : > { %v465_v17 = vpop.trf.xlu1 }
 0x24e   : > { %498 = vst.msk [vmem:[%s683_s30 + $0xc8] sm:$0xff] %vm472_vm5, %v465_v17 }
 0x24f   : > { %v434_v18 = vpop.trf.xlu0 }
 0x250   : > { %483 = vst.msk [vmem:[%s683_s30 + $0x50] sm:$0xff] %vm472_vm5, %v434_v18 }
 0x251   : > { %v466_v19 = vpop.trf.xlu1 }
 0x252   : > { %499 = vst.msk [vmem:[%s683_s30 + $0xd0] sm:$0xff] %vm472_vm5, %v466_v19 }
 0x253   : > { %v435_v20 = vpop.trf.xlu0 }
 0x254   : > { %484 = vst.msk [vmem:[%s683_s30 + $0x58] sm:$0xff] %vm472_vm5, %v435_v20 }
 0x255   : > { %v467_v21 = vpop.trf.xlu1 }
 0x256   : > { %500 = vst.msk [vmem:[%s683_s30 + $0xd8] sm:$0xff] %vm472_vm5, %v467_v21 }
 0x257   : > { %v436_v22 = vpop.trf.xlu0 }
 0x258   : > { %485 = vst.msk [vmem:[%s683_s30 + $0x60] sm:$0xff] %vm472_vm5, %v436_v22 }
 0x259   : > { %v468_v23 = vpop.trf.xlu1 }
 0x25a   : > { %501 = vst.msk [vmem:[%s683_s30 + $0xe0] sm:$0xff] %vm472_vm5, %v468_v23 }
 0x25b   : > { %v437_v24 = vpop.trf.xlu0 }
 0x25c   : > { %486 = vst.msk [vmem:[%s683_s30 + $0x68] sm:$0xff] %vm472_vm5, %v437_v24 }
 0x25d   : > { %v469_v25 = vpop.trf.xlu1 }
 0x25e   : > { %502 = vst.msk [vmem:[%s683_s30 + $0xe8] sm:$0xff] %vm472_vm5, %v469_v25 }
 0x25f   : > { %v438_v26 = vpop.trf.xlu0 }
 0x260   : > { %487 = vst.msk [vmem:[%s683_s30 + $0x70] sm:$0xff] %vm472_vm5, %v438_v26 }
 0x261   : > { %v470_v27 = vpop.trf.xlu1 }
 0x262   : > { %503 = vst.msk [vmem:[%s683_s30 + $0xf0] sm:$0xff] %vm472_vm5, %v470_v27 }
 0x263   : > { %v439_v28 = vpop.trf.xlu0 }
 0x264   : > { %488 = vst.msk [vmem:[%s683_s30 + $0x78] sm:$0xff] %vm472_vm5, %v439_v28 }
 0x265   : > { %v471_v29 = vpop.trf.xlu1 }
 0x266   : > { %504 = vst.msk [vmem:[%s683_s30 + $0xf8] sm:$0xff] %vm472_vm5, %v471_v29 }
 0x267 PF: > { %s15_s18 = sadd.s32 1, %s595_s18  }
 0x268   : > { %p12_p5 = scmp.ge.s32.totalorder %s15_s18, 4  }
 0x26a   :  { %14 = sbr.rel (!%p12_p5) target bundleno = 1 (0x1), region = 70 }

</bundles_post_ra>
